<compile_context>
chip_gen: v5e
topology: v5e:2x2
jax: 0.10.0
libtpu: 0.0.40
codegen_flags: <defaults>
</compile_context>

<pallas_src>
import jax
import jax.numpy as jnp
from jax.experimental import pallas as pl
from jax.experimental.pallas import tpu as pltpu

GEN_INPUT_DIM = 11 + 3            # 14
GEN_LATENT_DIM = GEN_INPUT_DIM    # 14
GEN_OUTPUT_DIM = 11
IN_DIM = GEN_INPUT_DIM + GEN_LATENT_DIM   # 28
HIDDEN = 64
HID_PAD = 128                     # hidden dim padded to full lane width (zero-padded)

_SMALL_BATCH_FALLBACK = 2048      # below this, fused XLA beats pallas_call fixed overhead
_MAX_TB = 8192                    # keeps per-tile VMEM footprint modest on all generations


def _round_up(n, m):
    return ((n + m - 1) // m) * m


def _leaky_relu(x, slope=0.2):
    return jnp.where(x > 0, x, slope * x)


def generator_kernel(x_ref, w1_ref, b1_ref, w2_ref, b2_ref, w3_ref, b3_ref, o_ref):
    # x tile: (TB, 28).  w1/w2 are bf16 padded to 128 lanes, w3 is bf16 (128, 11);
    # biases are f32.  All matmuls accumulate in f32; epilogue stays f32.
    x = x_ref[...].astype(jnp.bfloat16)
    h = jnp.dot(x, w1_ref[...], preferred_element_type=jnp.float32) + b1_ref[...]
    h = _leaky_relu(h)                                                   # (TB, 128) f32
    h = jnp.dot(h.astype(jnp.bfloat16), w2_ref[...],
                preferred_element_type=jnp.float32) + b2_ref[...]
    h = _leaky_relu(h)                                                   # (TB, 128) f32
    o = jnp.dot(h.astype(jnp.bfloat16), w3_ref[...],
                preferred_element_type=jnp.float32) + b3_ref[...]        # (TB, 11)  f32
    o_ref[...] = o.astype(o_ref.dtype)


def _fused_xla_forward(x, kp):
    """Small-batch path: same bf16/f32 arithmetic, left to XLA to fuse into the caller."""
    bf = jnp.bfloat16
    h = _leaky_relu(jnp.dot(x.astype(bf), kp["w1"], preferred_element_type=jnp.float32)
                    + kp["b1"])
    h = _leaky_relu(jnp.dot(h.astype(bf), kp["w2"], preferred_element_type=jnp.float32)
                    + kp["b2"])
    return jnp.dot(h.astype(bf), kp["w3"], preferred_element_type=jnp.float32) + kp["b3"]


def _vmem_limit_bytes(tb, x_itemsize):
    # VMEM tiles are lane-padded to 128; account double-buffered in/out + live intermediates.
    in_bufs = 2 * tb * 128 * x_itemsize
    out_bufs = 2 * tb * 128 * 4
    interm = 4 * tb * HID_PAD * 4
    weights = 2 * (IN_DIM + HID_PAD + 1) * HID_PAD * 2 + 3 * HID_PAD * 4 + (1 << 20)
    est = in_bufs + out_bufs + interm + weights
    # 2x headroom, but stay within [32 MiB, 48 MiB] — safe on v5e/v6e (128 MiB physical)
    # and v7x (64 MiB physical).
    return int(min(max(2 * est, 32 << 20), 48 << 20))


def generator_forward(x, kparams, *, tb=4096, use_pallas=None):
    """x: (B, 28) float (f32 or bf16). kparams: see prepare_kernel_params.

    Returns (B, 11) float32.
    """
    B = x.shape[0]
    if use_pallas is None:
        use_pallas = B >= _SMALL_BATCH_FALLBACK
    if not use_pallas:
        return _fused_xla_forward(x, kparams)

    # Pad batch only to a multiple of 8 sublanes (no full-tile pad copy).
    B8 = _round_up(B, 8)
    tb = max(8, min(_round_up(tb, 8), _MAX_TB, B8))
    if B8 > 1024:
        # Keep the grid length >= 2 so the "parallel" axis can shard across v7x TensorCores.
        tb = min(tb, _round_up(pl.cdiv(B8, 2), 8))
    grid = pl.cdiv(B8, tb)

    if B8 != B:
        # Fuse the bf16 downcast into the (small) pad copy.
        x_in = jnp.zeros((B8, IN_DIM), jnp.bfloat16).at[:B].set(x.astype(jnp.bfloat16))
    else:
        x_in = x   # streamed as-is; kernel casts to bf16 on the fly

    w1, b1, w2, b2, w3, b3 = (kparams["w1"], kparams["b1"], kparams["w2"],
                              kparams["b2"], kparams["w3"], kparams["b3"])

    weight_bytes = sum(int(v.size) * v.dtype.itemsize for v in (w1, b1, w2, b2, w3, b3))
    cost = pl.CostEstimate(
        flops=2 * B8 * (IN_DIM * HID_PAD + HID_PAD * HID_PAD + HID_PAD * GEN_OUTPUT_DIM),
        transcendentals=0,
        bytes_accessed=int(x_in.size) * x_in.dtype.itemsize
        + B8 * GEN_OUTPUT_DIM * 4 + weight_bytes,
    )

    out = pl.pallas_call(
        generator_kernel,
        out_shape=jax.ShapeDtypeStruct((B8, GEN_OUTPUT_DIM), jnp.float32),
        grid=(grid,),
        in_specs=[
            pl.BlockSpec((tb, IN_DIM), lambda i: (i, 0)),            # streamed activations
            pl.BlockSpec((IN_DIM, HID_PAD), lambda i: (0, 0)),       # resident weights
            pl.BlockSpec((1, HID_PAD), lambda i: (0, 0)),
            pl.BlockSpec((HID_PAD, HID_PAD), lambda i: (0, 0)),
            pl.BlockSpec((1, HID_PAD), lambda i: (0, 0)),
            pl.BlockSpec((HID_PAD, GEN_OUTPUT_DIM), lambda i: (0, 0)),
            pl.BlockSpec((1, GEN_OUTPUT_DIM), lambda i: (0, 0)),
        ],
        out_specs=pl.BlockSpec((tb, GEN_OUTPUT_DIM), lambda i: (i, 0)),
        compiler_params=pltpu.CompilerParams(
            dimension_semantics=("parallel",),
            vmem_limit_bytes=_vmem_limit_bytes(tb, x_in.dtype.itemsize)),
        cost_estimate=cost,
    )(x_in, w1, b1, w2, b2, w3, b3)

    return out[:B] if B8 != B else out


def init_params(key):
    """Deterministic init mimicking PyTorch Linear default (U[-1/sqrt(fan_in), 1/sqrt(fan_in)]).

    Logical (unpadded, f32) parameters, weights stored as (in, out)."""
    ks = jax.random.split(key, 6)

    def lin(kw, kb, fan_in, fan_out):
        bound = 1.0 / jnp.sqrt(fan_in)
        w = jax.random.uniform(kw, (fan_in, fan_out), jnp.float32, -bound, bound)
        b = jax.random.uniform(kb, (1, fan_out), jnp.float32, -bound, bound)
        return w, b

    w1, b1 = lin(ks[0], ks[1], IN_DIM, HIDDEN)
    w2, b2 = lin(ks[2], ks[3], HIDDEN, HIDDEN)
    w3, b3 = lin(ks[4], ks[5], HIDDEN, GEN_OUTPUT_DIM)
    return dict(w1=w1, b1=b1, w2=w2, b2=b2, w3=w3, b3=b3)


def prepare_kernel_params(params):
    """Zero-pad hidden dims to 128 lanes, cast matmul weights to bf16.

    The last layer keeps its true 11-wide output so the kernel writes a narrow output."""
    bf = jnp.bfloat16
    w1 = jnp.zeros((IN_DIM, HID_PAD), bf).at[:, :HIDDEN].set(params["w1"].astype(bf))
    b1 = jnp.zeros((1, HID_PAD), jnp.float32).at[:, :HIDDEN].set(params["b1"])
    w2 = jnp.zeros((HID_PAD, HID_PAD), bf).at[:HIDDEN, :HIDDEN].set(params["w2"].astype(bf))
    b2 = jnp.zeros((1, HID_PAD), jnp.float32).at[:, :HIDDEN].set(params["b2"])
    w3 = jnp.zeros((HID_PAD, GEN_OUTPUT_DIM), bf).at[:HIDDEN, :].set(params["w3"].astype(bf))
    b3 = params["b3"].astype(jnp.float32)                      # (1, 11)
    return dict(w1=w1, b1=b1, w2=w2, b2=b2, w3=w3, b3=b3)


def reference_forward_f32(x, p):
    """Plain-JAX f32 reference matching the PyTorch module exactly."""
    h = _leaky_relu(x @ p["w1"] + p["b1"])
    h = _leaky_relu(h @ p["w2"] + p["b2"])
    return h @ p["w3"] + p["b3"]


def reference_forward_bf16(x, kp):
    """Plain-JAX reference using the same padded bf16 params / f32 accumulation as the kernel."""
    return _fused_xla_forward(x, kp)


if __name__ == "__main__":
    key = jax.random.PRNGKey(0)
    k_params, k_x1, k_x2 = jax.random.split(key, 3)

    params = init_params(k_params)
    kparams = prepare_kernel_params(params)

    # --- Test 1: aligned batch (B multiple of 8), forced Pallas path -----------------
    B1 = 64
    x1 = jax.random.normal(k_x1, (B1, IN_DIM), dtype=jnp.float32)   # concat(state14, latent14)
    out1 = jax.block_until_ready(generator_forward(x1, kparams, use_pallas=True))
    ref1_bf16 = reference_forward_bf16(x1, kparams)
    ref1_f32 = reference_forward_f32(x1, params)
    assert out1.shape == (B1, GEN_OUTPUT_DIM)
    assert jnp.allclose(out1, ref1_bf16, atol=2e-3, rtol=2e-3), "mismatch vs bf16 reference (B=64)"
    assert jnp.allclose(out1, ref1_f32, atol=1e-1, rtol=1e-1), "mismatch vs f32 reference (B=64)"

    # --- Test 2: ragged batch (B=37, tb=16): pad-to-8 + ragged last grid step --------
    B2 = 37
    x2 = jax.random.normal(k_x2, (B2, IN_DIM), dtype=jnp.float32)
    out2 = jax.block_until_ready(generator_forward(x2, kparams, tb=16, use_pallas=True))
    ref2_bf16 = reference_forward_bf16(x2, kparams)
    assert out2.shape == (B2, GEN_OUTPUT_DIM)
    assert jnp.allclose(out2, ref2_bf16, atol=2e-3, rtol=2e-3), "mismatch vs bf16 reference (B=37)"

    # --- Test 3: small-batch fused-XLA fallback ---------------------------------------
    out3 = jax.block_until_ready(generator_forward(x2[:4], kparams))    # auto -> fallback
    assert jnp.allclose(out3, ref2_bf16[:4], atol=2e-3, rtol=2e-3), "fallback mismatch"

    print("KERNEL_OK")
</pallas_src>

<mosaic_0001>
module attributes {stable_mosaic.version = 11 : i64} {
  func.func @generator_kernel(%arg0: i32, %arg1: memref<64x28xf32, #tpu.memory_space<vmem>>, %arg2: memref<28x128xbf16, #tpu.memory_space<vmem>>, %arg3: memref<1x128xf32, #tpu.memory_space<vmem>>, %arg4: memref<128x128xbf16, #tpu.memory_space<vmem>>, %arg5: memref<1x128xf32, #tpu.memory_space<vmem>>, %arg6: memref<128x11xbf16, #tpu.memory_space<vmem>>, %arg7: memref<1x11xf32, #tpu.memory_space<vmem>>, %arg8: memref<64x11xf32, #tpu.memory_space<vmem>>) attributes {dimension_semantics = [#tpu.dimension_semantics<parallel>], iteration_bounds = array<i64: 1>, scalar_prefetch = 0 : i64, scratch_operands = 0 : i64, tpu.core_type = #tpu.core_type<tc>, window_params = [{transform_indices = @transform_0, window_bounds = array<i64: 64, 28>}, {pipeline_mode = #tpu.pipeline_mode<synchronous>, transform_indices = @transform_1, window_bounds = array<i64: 28, 128>}, {pipeline_mode = #tpu.pipeline_mode<synchronous>, transform_indices = @transform_2, window_bounds = array<i64: 1, 128>}, {pipeline_mode = #tpu.pipeline_mode<synchronous>, transform_indices = @transform_3, window_bounds = array<i64: 128, 128>}, {pipeline_mode = #tpu.pipeline_mode<synchronous>, transform_indices = @transform_4, window_bounds = array<i64: 1, 128>}, {pipeline_mode = #tpu.pipeline_mode<synchronous>, transform_indices = @transform_5, window_bounds = array<i64: 128, 11>}, {pipeline_mode = #tpu.pipeline_mode<synchronous>, transform_indices = @transform_6, window_bounds = array<i64: 1, 11>}, {transform_indices = @transform_7, window_bounds = array<i64: 64, 11>}]} {
    %c0 = arith.constant 0 : index
    %c0_0 = arith.constant 0 : index
    %0 = vector.load %arg1[%c0, %c0_0] : memref<64x28xf32, #tpu.memory_space<vmem>>, vector<64x28xf32>
    %1 = arith.truncf %0 : vector<64x28xf32> to vector<64x28xbf16>
    %c0_1 = arith.constant 0 : index
    %c0_2 = arith.constant 0 : index
    %2 = vector.load %arg2[%c0_1, %c0_2] : memref<28x128xbf16, #tpu.memory_space<vmem>>, vector<28x128xbf16>
    %cst = arith.constant dense<0.000000e+00> : vector<64x128xf32>
    %3 = tpu.matmul %1, %2, %cst {dimension_numbers = #tpu.dot_dimension_numbers<[1], [0], [0], [1], [0, 0, 1, 1], [], []>} : vector<64x28xbf16>, vector<28x128xbf16>, vector<64x128xf32> -> vector<64x128xf32>
    %c0_3 = arith.constant 0 : index
    %c0_4 = arith.constant 0 : index
    %4 = vector.load %arg3[%c0_3, %c0_4] : memref<1x128xf32, #tpu.memory_space<vmem>>, vector<1x128xf32>
    %5 = vector.broadcast %4 : vector<1x128xf32> to vector<64x128xf32>
    %6 = arith.addf %3, %5 : vector<64x128xf32>
    %cst_5 = arith.constant 0.000000e+00 : f32
    %7 = vector.broadcast %cst_5 : f32 to vector<64x128xf32>
    %8 = arith.cmpf ogt, %6, %7 : vector<64x128xf32>
    %cst_6 = arith.constant 2.000000e-01 : f32
    %9 = vector.broadcast %cst_6 : f32 to vector<64x128xf32>
    %10 = arith.mulf %9, %6 : vector<64x128xf32>
    %11 = arith.select %8, %6, %10 : vector<64x128xi1>, vector<64x128xf32>
    %12 = arith.truncf %11 : vector<64x128xf32> to vector<64x128xbf16>
    %c0_7 = arith.constant 0 : index
    %c0_8 = arith.constant 0 : index
    %13 = vector.load %arg4[%c0_7, %c0_8] : memref<128x128xbf16, #tpu.memory_space<vmem>>, vector<128x128xbf16>
    %cst_9 = arith.constant dense<0.000000e+00> : vector<64x128xf32>
    %14 = tpu.matmul %12, %13, %cst_9 {dimension_numbers = #tpu.dot_dimension_numbers<[1], [0], [0], [1], [0, 0, 1, 1], [], []>} : vector<64x128xbf16>, vector<128x128xbf16>, vector<64x128xf32> -> vector<64x128xf32>
    %c0_10 = arith.constant 0 : index
    %c0_11 = arith.constant 0 : index
    %15 = vector.load %arg5[%c0_10, %c0_11] : memref<1x128xf32, #tpu.memory_space<vmem>>, vector<1x128xf32>
    %16 = vector.broadcast %15 : vector<1x128xf32> to vector<64x128xf32>
    %17 = arith.addf %14, %16 : vector<64x128xf32>
    %cst_12 = arith.constant 0.000000e+00 : f32
    %18 = vector.broadcast %cst_12 : f32 to vector<64x128xf32>
    %19 = arith.cmpf ogt, %17, %18 : vector<64x128xf32>
    %cst_13 = arith.constant 2.000000e-01 : f32
    %20 = vector.broadcast %cst_13 : f32 to vector<64x128xf32>
    %21 = arith.mulf %20, %17 : vector<64x128xf32>
    %22 = arith.select %19, %17, %21 : vector<64x128xi1>, vector<64x128xf32>
    %23 = arith.truncf %22 : vector<64x128xf32> to vector<64x128xbf16>
    %c0_14 = arith.constant 0 : index
    %c0_15 = arith.constant 0 : index
    %24 = vector.load %arg6[%c0_14, %c0_15] : memref<128x11xbf16, #tpu.memory_space<vmem>>, vector<128x11xbf16>
    %cst_16 = arith.constant dense<0.000000e+00> : vector<64x11xf32>
    %25 = tpu.matmul %23, %24, %cst_16 {dimension_numbers = #tpu.dot_dimension_numbers<[1], [0], [0], [1], [0, 0, 1, 1], [], []>} : vector<64x128xbf16>, vector<128x11xbf16>, vector<64x11xf32> -> vector<64x11xf32>
    %c0_17 = arith.constant 0 : index
    %c0_18 = arith.constant 0 : index
    %26 = vector.load %arg7[%c0_17, %c0_18] : memref<1x11xf32, #tpu.memory_space<vmem>>, vector<1x11xf32>
    %27 = vector.broadcast %26 : vector<1x11xf32> to vector<64x11xf32>
    %28 = arith.addf %25, %27 : vector<64x11xf32>
    %c0_19 = arith.constant 0 : index
    %c0_20 = arith.constant 0 : index
    %29 = vector.load %arg8[%c0_19, %c0_20] : memref<64x11xf32, #tpu.memory_space<vmem>>, vector<64x11xf32>
    tpu.vector_store %arg8[%c0_19, %c0_20], %28 {strides = array<i32>} : memref<64x11xf32, #tpu.memory_space<vmem>>, vector<64x11xf32>,
    return
  }
  func.func @transform_0(%arg0: i32) -> (i32, i32) {
    %c0_i32 = arith.constant 0 : i32
    %c0_i32_0 = arith.constant 0 : i32
    return %arg0, %c0_i32 : i32, i32
  }
  func.func @transform_1(%arg0: i32) -> (i32, i32) {
    %c0_i32 = arith.constant 0 : i32
    %c0_i32_0 = arith.constant 0 : i32
    %c0_i32_1 = arith.constant 0 : i32
    return %c0_i32, %c0_i32_0 : i32, i32
  }
  func.func @transform_2(%arg0: i32) -> (i32, i32) {
    %c0_i32 = arith.constant 0 : i32
    %c0_i32_0 = arith.constant 0 : i32
    %c0_i32_1 = arith.constant 0 : i32
    return %c0_i32, %c0_i32_0 : i32, i32
  }
  func.func @transform_3(%arg0: i32) -> (i32, i32) {
    %c0_i32 = arith.constant 0 : i32
    %c0_i32_0 = arith.constant 0 : i32
    %c0_i32_1 = arith.constant 0 : i32
    return %c0_i32, %c0_i32_0 : i32, i32
  }
  func.func @transform_4(%arg0: i32) -> (i32, i32) {
    %c0_i32 = arith.constant 0 : i32
    %c0_i32_0 = arith.constant 0 : i32
    %c0_i32_1 = arith.constant 0 : i32
    return %c0_i32, %c0_i32_0 : i32, i32
  }
  func.func @transform_5(%arg0: i32) -> (i32, i32) {
    %c0_i32 = arith.constant 0 : i32
    %c0_i32_0 = arith.constant 0 : i32
    %c0_i32_1 = arith.constant 0 : i32
    return %c0_i32, %c0_i32_0 : i32, i32
  }
  func.func @transform_6(%arg0: i32) -> (i32, i32) {
    %c0_i32 = arith.constant 0 : i32
    %c0_i32_0 = arith.constant 0 : i32
    %c0_i32_1 = arith.constant 0 : i32
    return %c0_i32, %c0_i32_0 : i32, i32
  }
  func.func @transform_7(%arg0: i32) -> (i32, i32) {
    %c0_i32 = arith.constant 0 : i32
    %c0_i32_0 = arith.constant 0 : i32
    return %arg0, %c0_i32 : i32, i32
  }
}

</mosaic_0001>

<bundles_post_ra>
// kernel: tpu_custom_call.1
= control target key start
LH: loop header
LB: loop body
LE: loop exit
PB: predicated region body
PF: predicated region fallthrough
CT: control target
= control target key end

     0   :  { %vm71_vm0 = vcmask 1045504   ;;  %vm58_vm1 = vcmask 228352   ;;  %s646_s1 = inlined_call_operand.vmem [shape: bf16[28,128], index: 1, kind: input, shape index: {}]   ;;  %s647_s0 = inlined_call_operand.vmem [shape: f32[64,28], index: 0, kind: input, shape index: {}]   ;;  %s648_s2 = inlined_call_operand.vmem [shape: f32[1,128], index: 2, kind: input, shape index: {}]   ;;  %s649_s3 = inlined_call_operand.vmem [shape: bf16[128,128], index: 3, kind: input, shape index: {}]   ;;  %s650_s4 = inlined_call_operand.vmem [shape: f32[1,128], index: 4, kind: input, shape index: {}]   ;;  %s651_s5 = inlined_call_operand.vmem [shape: bf16[128,11], index: 5, kind: input, shape index: {}]   ;;  %s652_s6 = inlined_call_operand.vmem [shape: f32[1,11], index: 6, kind: input, shape index: {}]   ;;  %s653_s7 = inlined_call_operand.vmem [shape: f32[64,11], index: 7, kind: output, shape index: {}]  }
   0x1   :  { %v373_v0 = vld [vmem:[%s646_s1 + $0x8] sm:$0xf]  ;;  %v444_v1 = vld [vmem:[%s646_s1 + $0x8] sm:$0x30]  ;;  %v443_v4 = vld [vmem:[%s646_s1] sm:$0xff] }
   0x2   :  { %v374_v2 = vor.u32 %v444_v1, %v373_v0  ;;  %v27_v5 = vld [vmem:[%s647_s0] sm:$0xff]  ;;  %v28_v6 = vld [vmem:[%s647_s0 + $0x8] sm:$0xff]  ;;  %v29_v8 = vld [vmem:[%s647_s0 + $0x10] sm:$0xff] }
   0x3   :  { %v35_v7 = vpack.c.bf16 %v28_v6, %v27_v5  ;;  %v30_v9 = vld [vmem:[%s647_s0 + $0x18] sm:$0xff]  ;;  %v451_v12 = vld [vmem:[%s649_s3 + $0x30] sm:$0xff]  ;;  %v450_v13 = vld [vmem:[%s649_s3 + $0x28] sm:$0xff] }
   0x4   :  { %v73_v3 = vsel %vm71_vm0, %v374_v2, 0  ;;  %v36_v10 = vpack.c.bf16 %v30_v9, %v29_v8  ;;  %v452_v11 = vld [vmem:[%s649_s3 + $0x38] sm:$0xff]  ;;  %v31_v14 = vld [vmem:[%s647_s0 + $0x20] sm:$0xff]  ;;  %v32_v15 = vld [vmem:[%s647_s0 + $0x28] sm:$0xff] }
   0x5   :  { %81 = vmatpush.bf16.msra.mxu0 %v73_v3  ;;  %200 = vmatpush.bf16.msra.mxu1 %v452_v11  ;;  %v449_v16 = vld [vmem:[%s649_s3 + $0x20] sm:$0xff]  ;;  %v37_v17 = vpack.c.bf16 %v32_v15, %v31_v14  ;;  %v33_v18 = vld [vmem:[%s647_s0 + $0x30] sm:$0xff]  ;;  %v34_v19 = vld [vmem:[%s647_s0 + $0x38] sm:$0xff] }
   0x6   :  { %461 = vmatpush.bf16.msra.mxu3 %v452_v11  ;;  %v38_v20 = vpack.c.bf16 %v34_v19, %v33_v18  ;;  %v448_v21 = vld [vmem:[%s649_s3 + $0x18] sm:$0xff]  ;;  %v447_v22 = vld [vmem:[%s649_s3 + $0x10] sm:$0xff]  ;;  %v446_v23 = vld [vmem:[%s649_s3 + $0x8] sm:$0xff] }
   0x7   :  { %v445_v24 = vld [vmem:[%s649_s3] sm:$0xff]  ;;  %v460_v45 = vld [vmem:[%s651_s5 + $0x38] sm:$0xff]  ;;  %v459_v46 = vld [vmem:[%s651_s5 + $0x30] sm:$0xff] }
   0x8   :  { %v477_v26 = vld [vmem:[%s648_s2] ss:$0 sm:$0xff]  ;;  %469 = vmatpush.bf16.msra.mxu2 %v460_v45  ;;  %v458_v48 = vld [vmem:[%s651_s5 + $0x28] sm:$0xff]  ;;  %v456_v2 = vld [vmem:[%s651_s5 + $0x18] sm:$0xff] }
   0x9   :  { %82 = vmatpush.bf16.msra.mxu0 %v443_v4  ;;  %201 = vmatpush.bf16.msra.mxu1 %v451_v12  ;;  %v457_v52 = vld [vmem:[%s651_s5 + $0x20] sm:$0xff]  ;;  %v455_v3 = vld [vmem:[%s651_s5 + $0x10] sm:$0xff]  ;;  %v454_v4 = vld [vmem:[%s651_s5 + $0x8] sm:$0xff] }
   0xa   :  { %462 = vmatpush.bf16.msra.mxu3 %v451_v12  ;;  %v453_v5 = vld [vmem:[%s651_s5] sm:$0xff] }
   0xc   :  { %375 = vmatmul.msk.bf16.vlgmr.msra.gmra.mxu0 %vm58_vm1, %v35_v7  ;;  %470 = vmatpush.bf16.msra.mxu2 %v459_v46  ;;  %v478_v7 = vld [vmem:[%s650_s4] ss:$0 sm:$0xff] }
   0xd   :  { %202 = vmatpush.bf16.msra.mxu1 %v450_v13 }
   0xe   :  { %463 = vmatpush.bf16.msra.mxu3 %v450_v13 }
  0x10   :  { %471 = vmatpush.bf16.msra.mxu2 %v458_v48 }
  0x11   :  { %203 = vmatpush.bf16.msra.mxu1 %v449_v16 }
  0x12   :  { %464 = vmatpush.bf16.msra.mxu3 %v449_v16 }
  0x14   :  { %472 = vmatpush.bf16.msra.mxu2 %v457_v52 }
  0x15   :  { %204 = vmatpush.bf16.msra.mxu1 %v448_v21 }
  0x16   :  { %465 = vmatpush.bf16.msra.mxu3 %v448_v21 }
  0x18   :  { %473 = vmatpush.bf16.msra.mxu2 %v456_v2 }
  0x19   :  { %205 = vmatpush.bf16.msra.mxu1 %v447_v22 }
  0x1a   :  { %466 = vmatpush.bf16.msra.mxu3 %v447_v22 }
  0x1c   :  { %376 = vmatmul.msk.bf16.gmra.mxu0 %vm58_vm1, %v36_v10  ;;  %474 = vmatpush.bf16.msra.mxu2 %v455_v3 }
  0x1d   :  { %206 = vmatpush.bf16.msra.mxu1 %v446_v23 }
  0x1e   :  { %467 = vmatpush.bf16.msra.mxu3 %v446_v23 }
  0x20   :  { %475 = vmatpush.bf16.msra.mxu2 %v454_v4 }
  0x21   :  { %207 = vmatpush.bf16.msra.mxu1 %v445_v24 }
  0x22   :  { %468 = vmatpush.bf16.msra.mxu3 %v445_v24 }
  0x24   :  { %476 = vmatpush.bf16.msra.mxu2 %v453_v5 }
  0x25   :  { %325 = vmatpush.bf16.msrb.mxu1 %v460_v45 }
  0x29   :  { %326 = vmatpush.bf16.msrb.mxu1 %v459_v46 }
  0x2c   :  { %377 = vmatmul.msk.bf16.gmra.mxu0 %vm58_vm1, %v37_v17 }
  0x2d   :  { %327 = vmatpush.bf16.msrb.mxu1 %v458_v48 }
  0x31   :  { %328 = vmatpush.bf16.msrb.mxu1 %v457_v52 }
  0x35   :  { %329 = vmatpush.bf16.msrb.mxu1 %v456_v2 }
  0x39   :  { %330 = vmatpush.bf16.msrb.mxu1 %v455_v3 }
  0x3c   :  { %378 = vmatmul.msk.bf16.gmra.mxu0 %vm58_vm1, %v38_v20 }
  0x3d   :  { %331 = vmatpush.bf16.msrb.mxu1 %v454_v4 }
  0x41   :  { %332 = vmatpush.bf16.msrb.mxu1 %v453_v5 }
  0x89   :  { %v84_v25 = vpop.f32.mrf.mxu0 }
  0x8a   :  { %v85_v27 = vadd.f32 %v477_v26, %v84_v25 }
  0x8c   :  { %v112_v29 = vmul.f32 0.2, %v85_v27  ;;  %vm104_vm2 = vcmp.gt.f32.partialorder %v85_v27, 0.0 }
  0x8e   :  { %v120_v32 = vsel %vm104_vm2, %v85_v27, %v112_v29  ;;  %vm354_vm2 = vcmask 89088  }
  0x91   :  { %v86_v28 = vpop.f32.mrf.mxu0 }
  0x92   :  { %v87_v30 = vadd.f32 %v477_v26, %v86_v28 }
  0x94   :  { %v113_v31 = vmul.f32 0.2, %v87_v30  ;;  %vm105_vm3 = vcmp.gt.f32.partialorder %v87_v30, 0.0 }
  0x96   :  { %v121_v33 = vsel %vm105_vm3, %v87_v30, %v113_v31 }
  0x97   :  { %v128_v34 = vpack.c.bf16 %v121_v33, %v120_v32 }
  0x99   :  { %v89_v35 = vpop.f32.mrf.mxu0  ;;  %208 = vmatmul.bf16.vlgmr.msra.gmra.mxu1 %v128_v34 }
  0x9a   :  { %v90_v36 = vadd.f32 %v477_v26, %v89_v35 }
  0x9c   :  { %v114_v38 = vmul.f32 0.2, %v90_v36  ;;  %vm106_vm4 = vcmp.gt.f32.partialorder %v90_v36, 0.0 }
  0x9e   :  { %v122_v41 = vsel %vm106_vm4, %v90_v36, %v114_v38 }
  0xa1   :  { %v91_v37 = vpop.f32.mrf.mxu0 }
  0xa2   :  { %v92_v39 = vadd.f32 %v477_v26, %v91_v37 }
  0xa4   :  { %v115_v40 = vmul.f32 0.2, %v92_v39  ;;  %vm107_vm5 = vcmp.gt.f32.partialorder %v92_v39, 0.0 }
  0xa6   :  { %v123_v42 = vsel %vm107_vm5, %v92_v39, %v115_v40 }
  0xa7   :  { %v129_v43 = vpack.c.bf16 %v123_v42, %v122_v41 }
  0xa9   :  { %v94_v44 = vpop.f32.mrf.mxu0  ;;  %213 = vmatmul.bf16.vlgmr.msra.gmra.mxu3 %v129_v43  ;;  %v479_v43 = vld [vmem:[%s652_s6] ss:$0 sm:$0xff] }
  0xaa   :  { %v95_v47 = vadd.f32 %v477_v26, %v94_v44 }
  0xac   :  { %v116_v50 = vmul.f32 0.2, %v95_v47  ;;  %vm108_vm6 = vcmp.gt.f32.partialorder %v95_v47, 0.0 }
  0xae   :  { %v124_v54 = vsel %vm108_vm6, %v95_v47, %v116_v50 }
  0xb1   :  { %v96_v49 = vpop.f32.mrf.mxu0 }
  0xb2   :  { %v97_v51 = vadd.f32 %v477_v26, %v96_v49 }
  0xb4   :  { %v117_v53 = vmul.f32 0.2, %v97_v51  ;;  %vm109_vm7 = vcmp.gt.f32.partialorder %v97_v51, 0.0 }
  0xb6   :  { %v125_v55 = vsel %vm109_vm7, %v97_v51, %v117_v53 }
  0xb7   :  { %v130_v56 = vpack.c.bf16 %v125_v55, %v124_v54 }
  0xb9   :  { %v99_v57 = vpop.f32.mrf.mxu0  ;;  %218 = vmatmul.bf16.gmra.mxu3 %v130_v56 }
  0xba   :  { %v100_v58 = vadd.f32 %v477_v26, %v99_v57 }
  0xbc   :  { %v118_v60 = vmul.f32 0.2, %v100_v58  ;;  %vm110_vm8 = vcmp.gt.f32.partialorder %v100_v58, 0.0 }
  0xbe   :  { %v126_v63 = vsel %vm110_vm8, %v100_v58, %v118_v60 }
  0xc1   :  { %v101_v59 = vpop.f32.mrf.mxu0 }
  0xc2   :  { %v102_v61 = vadd.f32 %v477_v26, %v101_v59 }
  0xc4   :  { %v119_v62 = vmul.f32 0.2, %v102_v61  ;;  %vm111_vm9 = vcmp.gt.f32.partialorder %v102_v61, 0.0 }
  0xc6   :  { %v127_v0 = vsel %vm111_vm9, %v102_v61, %v119_v62 }
  0xc7   :  { %v131_v1 = vpack.c.bf16 %v127_v0, %v126_v63 }
  0xc9   :  { %223 = vmatmul.bf16.gmra.mxu3 %v131_v1 }
 0x116   :  { %v209_v6 = vpop.f32.mrf.mxu1 }
 0x117   :  { %v210_v8 = vadd.f32 %v478_v7, %v209_v6 }
 0x119   :  { %v237_v10 = vmul.f32 0.2, %v210_v8  ;;  %vm229_vm10 = vcmp.gt.f32.partialorder %v210_v8, 0.0 }
 0x11b   :  { %v245_v13 = vsel %vm229_vm10, %v210_v8, %v237_v10 }
 0x11e   :  { %v211_v9 = vpop.f32.mrf.mxu1 }
 0x11f   :  { %v212_v11 = vadd.f32 %v478_v7, %v211_v9 }
 0x121   :  { %vm230_vm11 = vcmp.gt.f32.partialorder %v212_v11, 0.0  ;;  %v238_v12 = vmul.f32 0.2, %v212_v11 }
 0x123   :  { %v246_v14 = vsel %vm230_vm11, %v212_v11, %v238_v12 }
 0x124   :  { %v253_v15 = vpack.c.bf16 %v246_v14, %v245_v13 }
 0x126   :  { %333 = vmatmul.bf16.vlgmr.msrb.gmra.mxu1 %v253_v15 }
 0x12c   :  { %v214_v16 = vpop.f32.mrf.mxu3 }
 0x12d   :  { %v215_v17 = vadd.f32 %v478_v7, %v214_v16 }
 0x12f   :  { %v239_v19 = vmul.f32 0.2, %v215_v17  ;;  %vm231_vm12 = vcmp.gt.f32.partialorder %v215_v17, 0.0 }
 0x131   :  { %v247_v22 = vsel %vm231_vm12, %v215_v17, %v239_v19 }
 0x134   :  { %v216_v18 = vpop.f32.mrf.mxu3 }
 0x135   :  { %v217_v20 = vadd.f32 %v478_v7, %v216_v18 }
 0x137   :  { %v240_v21 = vmul.f32 0.2, %v217_v20  ;;  %vm232_vm13 = vcmp.gt.f32.partialorder %v217_v20, 0.0 }
 0x139   :  { %v248_v23 = vsel %vm232_vm13, %v217_v20, %v240_v21 }
 0x13a   :  { %v254_v24 = vpack.c.bf16 %v248_v23, %v247_v22 }
 0x13c   :  { %v219_v25 = vpop.f32.mrf.mxu3  ;;  %338 = vmatmul.bf16.vlgmr.msra.gmra.mxu2 %v254_v24 }
 0x13d   :  { %v220_v26 = vadd.f32 %v478_v7, %v219_v25 }
 0x13f   :  { %v241_v28 = vmul.f32 0.2, %v220_v26  ;;  %vm233_vm14 = vcmp.gt.f32.partialorder %v220_v26, 0.0 }
 0x141   :  { %v249_v31 = vsel %vm233_vm14, %v220_v26, %v241_v28 }
 0x144   :  { %v221_v27 = vpop.f32.mrf.mxu3 }
 0x145   :  { %v222_v29 = vadd.f32 %v478_v7, %v221_v27 }
 0x147   :  { %v242_v30 = vmul.f32 0.2, %v222_v29  ;;  %vm234_vm15 = vcmp.gt.f32.partialorder %v222_v29, 0.0 }
 0x149   :  { %v250_v32 = vsel %vm234_vm15, %v222_v29, %v242_v30 }
 0x14a   :  { %v255_v33 = vpack.c.bf16 %v250_v32, %v249_v31 }
 0x14c   :  { %v224_v34 = vpop.f32.mrf.mxu3  ;;  %343 = vmatmul.bf16.gmra.mxu2 %v255_v33 }
 0x14d   :  { %v225_v35 = vadd.f32 %v478_v7, %v224_v34 }
 0x14f   :  { %v243_v37 = vmul.f32 0.2, %v225_v35  ;;  %vm235_vm0 = vcmp.gt.f32.partialorder %v225_v35, 0.0 }
 0x151   :  { %v251_v40 = vsel %vm235_vm0, %v225_v35, %v243_v37 }
 0x154   :  { %v226_v36 = vpop.f32.mrf.mxu3 }
 0x155   :  { %v227_v38 = vadd.f32 %v478_v7, %v226_v36 }
 0x157   :  { %v244_v39 = vmul.f32 0.2, %v227_v38  ;;  %vm236_vm1 = vcmp.gt.f32.partialorder %v227_v38, 0.0 }
 0x159   :  { %v252_v41 = vsel %vm236_vm1, %v227_v38, %v244_v39 }
 0x15a   :  { %v256_v42 = vpack.c.bf16 %v252_v41, %v251_v40 }
 0x15c   :  { %348 = vmatmul.bf16.gmra.mxu2 %v256_v42 }
 0x1a3   :  { %v334_v44 = vpop.f32.mrf.mxu1 }
 0x1a4   :  { %v335_v45 = vadd.f32 %v479_v43, %v334_v44 }
 0x1a6   :  { %355 = vst.msk [vmem:[%s653_s7] sm:$0xff] %vm354_vm2, %v335_v45 }
 0x1ab   :  { %v336_v46 = vpop.f32.mrf.mxu1 }
 0x1ac   :  { %v337_v47 = vadd.f32 %v479_v43, %v336_v46 }
 0x1ae   :  { %356 = vst.msk [vmem:[%s653_s7 + $0x8] sm:$0xff] %vm354_vm2, %v337_v47 }
 0x1bf   :  { %v339_v48 = vpop.f32.mrf.mxu2 }
 0x1c0   :  { %v340_v49 = vadd.f32 %v479_v43, %v339_v48 }
 0x1c2   :  { %357 = vst.msk [vmem:[%s653_s7 + $0x10] sm:$0xff] %vm354_vm2, %v340_v49 }
 0x1c7   :  { %v341_v50 = vpop.f32.mrf.mxu2 }
 0x1c8   :  { %v342_v51 = vadd.f32 %v479_v43, %v341_v50 }
 0x1ca   :  { %358 = vst.msk [vmem:[%s653_s7 + $0x18] sm:$0xff] %vm354_vm2, %v342_v51 }
 0x1cf   :  { %v344_v52 = vpop.f32.mrf.mxu2 }
 0x1d0   :  { %v345_v53 = vadd.f32 %v479_v43, %v344_v52 }
 0x1d2   :  { %359 = vst.msk [vmem:[%s653_s7 + $0x20] sm:$0xff] %vm354_vm2, %v345_v53 }
 0x1d7   :  { %v346_v54 = vpop.f32.mrf.mxu2 }
 0x1d8   :  { %v347_v55 = vadd.f32 %v479_v43, %v346_v54 }
 0x1da   :  { %360 = vst.msk [vmem:[%s653_s7 + $0x28] sm:$0xff] %vm354_vm2, %v347_v55 }
 0x1df   :  { %v349_v56 = vpop.f32.mrf.mxu2 }
 0x1e0   :  { %v350_v57 = vadd.f32 %v479_v43, %v349_v56 }
 0x1e2   :  { %361 = vst.msk [vmem:[%s653_s7 + $0x30] sm:$0xff] %vm354_vm2, %v350_v57 }
 0x1e7   :  { %v351_v58 = vpop.f32.mrf.mxu2 }
 0x1e8   :  { %v352_v59 = vadd.f32 %v479_v43, %v351_v58 }
 0x1ea   :  { %362 = vst.msk [vmem:[%s653_s7 + $0x38] sm:$0xff] %vm354_vm2, %v352_v59 }

</bundles_post_ra>
